<compile_context>
chip_gen: v7x
topology: tpu7x:2x2x1
jax: 0.10.0
libtpu: 0.0.40
codegen_flags: <defaults>
</compile_context>

<pallas_src>
import functools

import jax
import jax.numpy as jnp
from jax.experimental import pallas as pl
from jax.experimental.pallas import tpu as pltpu


def _round_up(x: int, m: int) -> int:
    return (x + m - 1) // m * m


def expert_kernel(x_ref, wt_ref, b_ref, o_ref, acc_ref):
    # x_ref:  [tm, tk]   tokens x in-features
    # wt_ref: [tk, tn]   pre-transposed weight tile
    # b_ref:  [1,  tn]   bias tile
    # o_ref:  [tm, tn]
    # acc_ref:[tm, tn]   f32 accumulator (persists across the K grid axis)
    k = pl.program_id(2)

    @pl.when(k == 0)
    def _():
        acc_ref[...] = jnp.zeros_like(acc_ref)

    acc_ref[...] += jnp.dot(
        x_ref[...], wt_ref[...], preferred_element_type=jnp.float32
    )

    @pl.when(k == pl.num_programs(2) - 1)
    def _():
        y = acc_ref[...] + b_ref[...].astype(jnp.float32)  # bias only in finalize
        o_ref[...] = jnp.maximum(y, 0.0).astype(o_ref.dtype)


@functools.partial(jax.jit, static_argnames=("tm", "tn", "tk"))
def _expert_forward_2d(x2d, wt, bias, *, tm, tn, tk):
    m, d_in = x2d.shape
    d_out = wt.shape[1]
    dtype = x2d.dtype

    # --- pad to lane/tile-friendly shapes -----------------------------------
    d_in_p = _round_up(d_in, 128)
    d_out_p = _round_up(d_out, 128)
    tk = min(tk, d_in_p)
    tn = min(tn, d_out_p)
    tm = min(tm, _round_up(m, 8))

    m_p = _round_up(m, tm)
    d_in_p = _round_up(d_in_p, tk)
    d_out_p = _round_up(d_out_p, tn)

    if (m_p, d_in_p) != (m, d_in):
        x2d = jnp.pad(x2d, ((0, m_p - m), (0, d_in_p - d_in)))
    if (d_in_p, d_out_p) != wt.shape:
        wt = jnp.pad(wt, ((0, d_in_p - wt.shape[0]), (0, d_out_p - wt.shape[1])))
    b2d = bias.reshape(1, d_out)
    if d_out_p != d_out:
        b2d = jnp.pad(b2d, ((0, 0), (0, d_out_p - d_out)))

    grid = (m_p // tm, d_out_p // tn, d_in_p // tk)
    itemsize = jnp.dtype(dtype).itemsize
    cost = pl.CostEstimate(
        flops=2 * m_p * d_in_p * d_out_p,
        transcendentals=0,
        bytes_accessed=(m_p * d_in_p + d_in_p * d_out_p + m_p * d_out_p + d_out_p)
        * itemsize,
    )

    out_p = pl.pallas_call(
        expert_kernel,
        out_shape=jax.ShapeDtypeStruct((m_p, d_out_p), dtype),
        grid_spec=pltpu.PrefetchScalarGridSpec(
            num_scalar_prefetch=0,
            grid=grid,
            in_specs=[
                pl.BlockSpec((tm, tk), lambda i, j, k: (i, k)),
                pl.BlockSpec((tk, tn), lambda i, j, k: (k, j)),
                pl.BlockSpec((1, tn), lambda i, j, k: (0, j)),
            ],
            out_specs=pl.BlockSpec((tm, tn), lambda i, j, k: (i, j)),
            scratch_shapes=[pltpu.VMEM((tm, tn), jnp.float32)],
        ),
        compiler_params=pltpu.CompilerParams(
            dimension_semantics=("parallel", "parallel", "arbitrary"),
        ),
        cost_estimate=cost,
    )(x2d, wt, b2d)

    return out_p[:m, :d_out]


def expert_forward(x, wt, bias, *, tm=256, tn=256, tk=512):
    """x: [batch, seq, d_model]; wt: [d_model_in, d_model_out] (PRE-TRANSPOSED
    PyTorch weight, i.e. y = x @ wt + bias); bias: [d_model_out]."""
    batch, seq, d_model = x.shape
    out2d = _expert_forward_2d(
        x.reshape(batch * seq, d_model), wt, bias, tm=tm, tn=tn, tk=tk
    )
    return out2d.reshape(batch, seq, -1)


def init_expert_params(key, d_model, dtype=jnp.float32):
    """nn.Linear default init U(-1/sqrt(d), 1/sqrt(d)).

    Returns the weight ALREADY transposed ([d_in, d_out]) so the forward path
    never pays a per-call transpose (perf-review item)."""
    kw, kb = jax.random.split(key)
    bound = 1.0 / float(d_model) ** 0.5
    weight = jax.random.uniform(kw, (d_model, d_model), dtype, -bound, bound)
    bias = jax.random.uniform(kb, (d_model,), dtype, -bound, bound)
    wt = weight.T  # one-time transpose at init (not in forward)
    return wt, bias


if __name__ == "__main__":
    key = jax.random.PRNGKey(0)

    # --- small demo shape matching the module (batch=2, seq=8, d_model=32) ---
    k_x, k_p, k_x2, k_p2 = jax.random.split(key, 4)
    batch, seq, d_model = 2, 8, 32
    x = jax.random.normal(k_x, (batch, seq, d_model), dtype=jnp.float32)
    wt, bias = init_expert_params(k_p, d_model)

    out = expert_forward(x, wt, bias)
    out = jax.block_until_ready(out)

    ref = jnp.maximum(x @ wt + bias, 0.0)  # same semantics as F.relu(self.fc(x))
    assert out.shape == (batch, seq, d_model)
    assert jnp.allclose(out, ref, atol=1e-4, rtol=1e-4)

    # --- second check exercising the real grid (multi-tile M/N/K + padding) ---
    b2, s2, d2 = 2, 160, 256
    x2 = jax.random.normal(k_x2, (b2, s2, d2), dtype=jnp.float32)
    wt2, bias2 = init_expert_params(k_p2, d2)
    out2 = expert_forward(x2, wt2, bias2, tm=128, tn=128, tk=128)
    out2 = jax.block_until_ready(out2)
    ref2 = jnp.maximum(x2 @ wt2 + bias2, 0.0)
    assert out2.shape == (b2, s2, d2)
    assert jnp.allclose(out2, ref2, atol=1e-4, rtol=1e-4)

    print("KERNEL_OK")
</pallas_src>

<mosaic_0001>
module attributes {stable_mosaic.version = 11 : i64} {
  func.func @expert_kernel(%arg0: i32, %arg1: i32, %arg2: i32, %arg3: memref<16x128xf32, #tpu.memory_space<vmem>>, %arg4: memref<128x128xf32, #tpu.memory_space<vmem>>, %arg5: memref<1x128xf32, #tpu.memory_space<vmem>>, %arg6: memref<16x128xf32, #tpu.memory_space<vmem>>, %arg7: memref<16x128xf32, #tpu.memory_space<vmem>>) attributes {dimension_semantics = [#tpu.dimension_semantics<parallel>, #tpu.dimension_semantics<parallel>, #tpu.dimension_semantics<arbitrary>], iteration_bounds = array<i64: 1, 1, 1>, scalar_prefetch = 0 : i64, scratch_operands = 1 : i64, tpu.core_type = #tpu.core_type<tc>, window_params = [{transform_indices = @transform_0, window_bounds = array<i64: 16, 128>}, {transform_indices = @transform_1, window_bounds = array<i64: 128, 128>}, {transform_indices = @transform_2, window_bounds = array<i64: 1, 128>}, {transform_indices = @transform_3, window_bounds = array<i64: 16, 128>}]} {
    %c0_i32 = arith.constant 0 : i32
    %0 = arith.cmpi eq, %arg2, %c0_i32 : i32
    %1 = arith.extui %0 : i1 to i32
    %c0_i32_0 = arith.constant 0 : i32
    %2 = arith.cmpi ne, %1, %c0_i32_0 : i32
    scf.if %2 {
      %cst_10 = arith.constant 0.000000e+00 : f32
      %12 = vector.broadcast %cst_10 : f32 to vector<16x128xf32>
      %c0_11 = arith.constant 0 : index
      %c0_12 = arith.constant 0 : index
      %13 = vector.load %arg7[%c0_11, %c0_12] : memref<16x128xf32, #tpu.memory_space<vmem>>, vector<16x128xf32>
      tpu.vector_store %arg7[%c0_11, %c0_12], %12 {strides = array<i32>} : memref<16x128xf32, #tpu.memory_space<vmem>>, vector<16x128xf32>,
    } else {
    }
    %c0 = arith.constant 0 : index
    %c0_1 = arith.constant 0 : index
    %3 = vector.load %arg7[%c0, %c0_1] : memref<16x128xf32, #tpu.memory_space<vmem>>, vector<16x128xf32>
    %c0_2 = arith.constant 0 : index
    %c0_3 = arith.constant 0 : index
    %4 = vector.load %arg3[%c0_2, %c0_3] : memref<16x128xf32, #tpu.memory_space<vmem>>, vector<16x128xf32>
    %c0_4 = arith.constant 0 : index
    %c0_5 = arith.constant 0 : index
    %5 = vector.load %arg4[%c0_4, %c0_5] : memref<128x128xf32, #tpu.memory_space<vmem>>, vector<128x128xf32>
    %cst = arith.constant dense<0.000000e+00> : vector<16x128xf32>
    %6 = tpu.matmul %4, %5, %cst {dimension_numbers = #tpu.dot_dimension_numbers<[1], [0], [0], [1], [0, 0, 1, 1], [], []>} : vector<16x128xf32>, vector<128x128xf32>, vector<16x128xf32> -> vector<16x128xf32>
    %7 = arith.addf %3, %6 : vector<16x128xf32>
    %c0_6 = arith.constant 0 : index
    %c0_7 = arith.constant 0 : index
    %8 = vector.load %arg7[%c0_6, %c0_7] : memref<16x128xf32, #tpu.memory_space<vmem>>, vector<16x128xf32>
    tpu.vector_store %arg7[%c0_6, %c0_7], %7 {strides = array<i32>} : memref<16x128xf32, #tpu.memory_space<vmem>>, vector<16x128xf32>,
    %c0_i32_8 = arith.constant 0 : i32
    %9 = arith.cmpi eq, %arg2, %c0_i32_8 : i32
    %10 = arith.extui %9 : i1 to i32
    %c0_i32_9 = arith.constant 0 : i32
    %11 = arith.cmpi ne, %10, %c0_i32_9 : i32
    scf.if %11 {
      %c0_10 = arith.constant 0 : index
      %c0_11 = arith.constant 0 : index
      %12 = vector.load %arg7[%c0_10, %c0_11] : memref<16x128xf32, #tpu.memory_space<vmem>>, vector<16x128xf32>
      %c0_12 = arith.constant 0 : index
      %c0_13 = arith.constant 0 : index
      %13 = vector.load %arg5[%c0_12, %c0_13] : memref<1x128xf32, #tpu.memory_space<vmem>>, vector<1x128xf32>
      %14 = vector.broadcast %13 : vector<1x128xf32> to vector<16x128xf32>
      %15 = arith.addf %12, %14 : vector<16x128xf32>
      %cst_14 = arith.constant 0.000000e+00 : f32
      %16 = vector.broadcast %cst_14 : f32 to vector<16x128xf32>
      %17 = arith.maximumf %15, %16 : vector<16x128xf32>
      %c0_15 = arith.constant 0 : index
      %c0_16 = arith.constant 0 : index
      %18 = vector.load %arg6[%c0_15, %c0_16] : memref<16x128xf32, #tpu.memory_space<vmem>>, vector<16x128xf32>
      tpu.vector_store %arg6[%c0_15, %c0_16], %17 {strides = array<i32>} : memref<16x128xf32, #tpu.memory_space<vmem>>, vector<16x128xf32>,
    } else {
    }
    return
  }
  func.func @transform_0(%arg0: i32, %arg1: i32, %arg2: i32) -> (i32, i32) {
    %c0_i32 = arith.constant 0 : i32
    return %arg0, %arg2 : i32, i32
  }
  func.func @transform_1(%arg0: i32, %arg1: i32, %arg2: i32) -> (i32, i32) {
    %c0_i32 = arith.constant 0 : i32
    return %arg2, %arg1 : i32, i32
  }
  func.func @transform_2(%arg0: i32, %arg1: i32, %arg2: i32) -> (i32, i32) {
    %c0_i32 = arith.constant 0 : i32
    %c0_i32_0 = arith.constant 0 : i32
    return %c0_i32, %arg1 : i32, i32
  }
  func.func @transform_3(%arg0: i32, %arg1: i32, %arg2: i32) -> (i32, i32) {
    %c0_i32 = arith.constant 0 : i32
    return %arg0, %arg1 : i32, i32
  }
}

</mosaic_0001>

<bundles_post_ra>
// kernel: _expert_forward_2d.1
= control target key start
LH: loop header
LB: loop body
LE: loop exit
PB: predicated region body
PF: predicated region fallthrough
CT: control target
= control target key end

     0   :  { %s359_s0 = inlined_call_operand.vmem [shape: f32[16,128], index: 0, kind: input, shape index: {}]   ;;  %s360_s1 = inlined_call_operand.vmem [shape: f32[128,128], index: 1, kind: input, shape index: {}]   ;;  %s361_s2 = inlined_call_operand.vmem [shape: f32[1,128], index: 2, kind: input, shape index: {}]   ;;  %s362_s3 = inlined_call_operand.hbm [shape: f32[16,128], index: 3, kind: output, shape index: {}]  }
   0x1   :  { %v25_v0 = vld [vmem:[%s360_s1] sm:$0xff]  ;;  %v26_v1 = vld [vmem:[%s360_s1 + $0x8] sm:$0xff]  ;;  %v27_v2 = vld [vmem:[%s360_s1 + $0x10] sm:$0xff] }
   0x2   :  { %v208_v3 = vpack.c.bf16 %v26_v1, %v25_v0  ;;  %v28_v4 = vld [vmem:[%s360_s1 + $0x18] sm:$0xff]  ;;  %v29_v6 = vld [vmem:[%s360_s1 + $0x20] sm:$0xff]  ;;  %v30_v7 = vld [vmem:[%s360_s1 + $0x28] sm:$0xff] }
   0x3   :  { %v212_v5 = vpack.c.bf16 %v28_v4, %v27_v2  ;;  %v216_v8 = vpack.c.bf16 %v30_v7, %v29_v6  ;;  %v23_v9 = vld [vmem:[%s359_s0] sm:$0xff]  ;;  %v31_v10 = vld [vmem:[%s360_s1 + $0x30] sm:$0xff]  ;;  %v32_v11 = vld [vmem:[%s360_s1 + $0x38] sm:$0xff] }
   0x4   :  { %209 = vmatprep.subr.bf16.mxu0 %v208_v3  ;;  %205 = vmatprep.mubr.f32.mxu0 %v23_v9 }
   0x5   :  { %211 = vmatpush3.bf16.msra.mxu0 %v208_v3 }
   0x6   :  { %213 = vmatprep.subr.bf16.mxu0 %v212_v5 }
   0x7   :  { %8 = vsyncpa [#allocation4], 0  ;;  %v220_v12 = vpack.c.bf16 %v32_v11, %v31_v10  ;;  %v33_v13 = vld [vmem:[%s360_s1 + $0x40] sm:$0xff]  ;;  %v34_v14 = vld [vmem:[%s360_s1 + $0x48] sm:$0xff]  ;;  %s267_s23 = smov [#allocation3]  }
   0x8   :  { %v224_v15 = vpack.c.bf16 %v34_v14, %v33_v13  ;;  %v35_v16 = vld [vmem:[%s360_s1 + $0x50] sm:$0xff]  ;;  %v36_v17 = vld [vmem:[%s360_s1 + $0x58] sm:$0xff]  ;;  %v37_v19 = vld [vmem:[%s360_s1 + $0x60] sm:$0xff]  ;;  %s143_s24 = sshll.u32 %s267_s23, 4  ;;  %s144_s24 = int_to_ptr.vmem [resolvable:$true] %s143_s24 }
   0x9   :  { %215 = vmatpush3.bf16.msra.mxu0 %v212_v5  ;;  %v228_v18 = vpack.c.bf16 %v36_v17, %v35_v16  ;;  %v38_v20 = vld [vmem:[%s360_s1 + $0x68] sm:$0xff]  ;;  %v39_v22 = vld [vmem:[%s360_s1 + $0x70] sm:$0xff]  ;;  %v40_v23 = vld [vmem:[%s360_s1 + $0x78] sm:$0xff]  ;;  %s243_s1 = scalar_lea.vmem %s144_s24, 256  ;;  %p248_p1 = scmp.lt.s32.totalorder %s144_s24, %s144_s24 }
   0xa   :  { %217 = vmatprep.subr.bf16.mxu0 %v216_v8  ;;  %v232_v21 = vpack.c.bf16 %v38_v20, %v37_v19  ;;  %v236_v24 = vpack.c.bf16 %v40_v23, %v39_v22  ;;  %v24_v25 = vld [vmem:[%s359_s0 + $0x8] sm:$0xff]  ;;  %v154_v26 = vld [vmem:[%s361_s2] ss:$0 sm:$0xff]  ;;  %p244_p0 = scmp.ne.s32.totalorder %s144_s24, %s243_s1  ;;  %p249_p2 = scmp.lt.s32.totalorder %s243_s1, %s243_s1 }
   0xc   :  { %p250_p3 = por %p249_p2, %p248_p1 }
   0xd   :  { %219 = vmatpush3.bf16.msra.mxu0 %v216_v8 }
   0xe   :  { %221 = vmatprep.subr.bf16.mxu0 %v220_v12  ;;  %p251_p4 = pnand %p250_p3, %p244_p0 }
  0x11   :  { %223 = vmatpush3.bf16.msra.mxu0 %v220_v12 }
  0x12   :  { %225 = vmatprep.subr.bf16.mxu0 %v224_v15 }
  0x15   :  { %227 = vmatpush3.bf16.msra.mxu0 %v224_v15 }
  0x16   :  { %229 = vmatprep.subr.bf16.mxu0 %v228_v18 }
  0x19   :  { %231 = vmatpush3.bf16.msra.mxu0 %v228_v18 }
  0x1a   :  { %233 = vmatprep.subr.bf16.mxu0 %v232_v21 }
  0x1d   :  { %235 = vmatpush3.bf16.msra.mxu0 %v232_v21 }
  0x1e   :  { %237 = vmatprep.subr.bf16.mxu0 %v236_v24 }
  0x21   :  { %239 = vmatpush3.bf16.msra.mxu0 %v236_v24 }
  0x24   :  { %206 = vmatmul.mubr.f32.vlgmr.msra.gmra.mrb[0].mxu0 %v24_v25 }
  0xf7   :  { %v207_v27 = vpop.f32.mrb[0].mxu0 }
  0xf8   :  { %v133_v28 = vadd.f32 %v207_v27, %v154_v26  ;;  %v107_v29 = vpop.f32.mrb[1].mxu0 }
  0xf9   :  { %v132_v30 = vadd.f32 %v154_v26, %v107_v29 }
  0xfa   :  { %v135_v31 = vmax.f32 %v133_v28, 0.0 }
  0xfb   :  { %v134_v32 = vmax.f32 %v132_v30, 0.0 }
  0xfc   :  { %137 = vst [vmem:[#allocation3 + $0x8] sm:$0xff] %v135_v31 }
  0xfd   :  { %136 = vst [vmem:[#allocation3] sm:$0xff] %v134_v32 }
  0xfe   :  { %254 = shalt.err (!%p251_p4)
}
  0xff   :  { %s255_s25 = scalar_lea.hbm %s362_s3, 256 }
 0x100   :  { %p256_p5 = scmp.ne.s32.totalorder %s362_s3, %s255_s25  ;;  %p259_p6 = scmp.lt.u32.totalorder %s255_s25, %s362_s3 }
 0x102   :  { %p261_p7 = pnand %p259_p6, %p256_p5 }
 0x104   :  { %264 = shalt.err (!%p261_p7)
}
 0x105   :  { %s268_s30 = smov 128   ;;  %s269_s4 = smov 8  }
 0x106   :  { %149 = dma.vmem_to_hbm [thread:$0]  %s144_s24, 256, %s362_s3, [#allocation4], %s268_s30, %s268_s30, %s269_s4  }
 0x107   :  { %265 = dma.done.wait [#allocation4], 256  }
 0x108   :  { %266 = vsyncadd [#allocation4], 4294967040 }
 0x109   :  { %153 = vsyncpa [#allocation4], 1 }

</bundles_post_ra>
